<compile_context>
chip_gen: v7x
topology: tpu7x:2x2x1
jax: 0.10.0
libtpu: 0.0.40
codegen_flags: <defaults>
</compile_context>

<pallas_src>
import jax
import jax.numpy as jnp
from jax import lax
from jax.experimental import pallas as pl
from jax.experimental.pallas import tpu as pltpu


def _round_up(x, m):
    return (x + m - 1) // m * m


def _linear_relu_kernel(x_ref, w_ref, b_ref, o_ref):
    # x_ref: (TM, K), w_ref: (TH, K), b_ref: (1, TH), o_ref: (TM, TH)
    # Contract x[.., K] with w[.., K] -> (TM, TH); f32 MXU accumulation.
    acc = lax.dot_general(
        x_ref[...], w_ref[...],
        dimension_numbers=(((1,), (1,)), ((), ())),
        preferred_element_type=jnp.float32,
    )
    acc = acc + b_ref[...]                      # bias broadcast over rows (f32)
    o_ref[...] = jnp.maximum(acc, 0.0).astype(o_ref.dtype)


def scan_encoder_forward(scan, weight, bias, *, tile_m=512, tile_h=512):
    """Equivalent of ScanEncoder.forward.

    scan:   (..., input_size)      float32
    weight: (hidden, input_size)   -- PyTorch nn.Linear convention (NOT transposed)
    bias:   (hidden,)
    returns: (1, 1, N*hidden) where N = prod(leading dims of scan)
    """
    input_size = scan.shape[-1]
    hidden = weight.shape[0]

    x2d = scan.reshape(-1, input_size)                   # (N, K)
    n = x2d.shape[0]

    # ---- lane-dense output: pad hidden up to a multiple of 128 ------------
    h_pad = _round_up(hidden, 128)
    if h_pad != hidden:
        # One-time parameter prep (lives at parameter-load time in a model).
        weight = jnp.pad(weight, ((0, h_pad - hidden), (0, 0)))
        bias = jnp.pad(bias, (0, h_pad - hidden))
    b2d = bias.reshape(1, h_pad)                         # (1, Hp)

    # ---- hidden tiling: largest multiple of 128 <= tile_h dividing h_pad --
    if h_pad <= tile_h:
        th = h_pad
    else:
        th = max(d for d in range(128, tile_h + 1, 128) if h_pad % d == 0)

    # ---- row tiling: uniform tiles, pad N up to a multiple of the tile ----
    tm = min(tile_m, _round_up(n, 8))
    n_pad = _round_up(n, tm)
    if n_pad != n:
        x2d = jnp.pad(x2d, ((0, n_pad - n), (0, 0)))

    grid = (n_pad // tm, h_pad // th)

    flops = 2 * n_pad * input_size * h_pad
    bytes_accessed = 4 * (n_pad * input_size                 # x (reused across j)
                          + grid[0] * h_pad * input_size     # W tiles per row tile
                          + grid[0] * h_pad                  # bias tiles
                          + n_pad * h_pad)                   # out

    out2d = pl.pallas_call(
        _linear_relu_kernel,
        out_shape=jax.ShapeDtypeStruct((n_pad, h_pad), scan.dtype),
        grid_spec=pltpu.PrefetchScalarGridSpec(
            num_scalar_prefetch=0,
            grid=grid,
            in_specs=[
                pl.BlockSpec((tm, input_size), lambda i, j: (i, 0)),  # x tile
                pl.BlockSpec((th, input_size), lambda i, j: (j, 0)),  # W tile
                pl.BlockSpec((1, th), lambda i, j: (0, j)),           # bias tile
            ],
            out_specs=pl.BlockSpec((tm, th), lambda i, j: (i, j)),
        ),
        compiler_params=pltpu.CompilerParams(
            dimension_semantics=("parallel", "parallel"),
            vmem_limit_bytes=32 * 1024 * 1024,
        ),
        cost_estimate=pl.CostEstimate(
            flops=flops, transcendentals=0, bytes_accessed=bytes_accessed),
    )(x2d, weight, b2d)

    # Strip row/column padding, then PyTorch's output.view(1, 1, -1).
    out = out2d[:n, :hidden]
    return out.reshape(1, 1, -1)


def _reference(scan, weight, bias):
    out = jnp.maximum(scan.reshape(-1, scan.shape[-1]) @ weight.T + bias, 0.0)
    return out.reshape(1, 1, -1)


if __name__ == "__main__":
    key = jax.random.PRNGKey(0)
    k_x, k_w, k_b = jax.random.split(key, 3)

    batch = 8            # number of scan rows (seq)
    input_size = 32
    hidden_size = 32

    scan = jax.random.normal(k_x, (batch, input_size), dtype=jnp.float32)

    # PyTorch nn.Linear parameter shapes/init:
    #   weight: (hidden_size, input_size), bias: (hidden_size,)
    bound = 1.0 / (input_size ** 0.5)
    weight = jax.random.uniform(
        k_w, (hidden_size, input_size), minval=-bound, maxval=bound,
        dtype=jnp.float32)
    bias = jax.random.uniform(
        k_b, (hidden_size,), minval=-bound, maxval=bound, dtype=jnp.float32)

    out = scan_encoder_forward(scan, weight, bias)
    out = jax.block_until_ready(out)

    ref = _reference(scan, weight, bias)
    assert out.shape == (1, 1, batch * hidden_size), out.shape
    assert jnp.allclose(out, ref, atol=1e-5, rtol=1e-5), "mismatch vs reference"

    print("KERNEL_OK")
</pallas_src>

<mosaic_0001>
module attributes {stable_mosaic.version = 11 : i64} {
  func.func @_linear_relu_kernel(%arg0: i32, %arg1: i32, %arg2: memref<8x32xf32, #tpu.memory_space<vmem>>, %arg3: memref<128x32xf32, #tpu.memory_space<vmem>>, %arg4: memref<1x128xf32, #tpu.memory_space<vmem>>, %arg5: memref<8x128xf32, #tpu.memory_space<vmem>>) attributes {dimension_semantics = [#tpu.dimension_semantics<parallel>, #tpu.dimension_semantics<parallel>], iteration_bounds = array<i64: 1, 1>, scalar_prefetch = 0 : i64, scratch_operands = 0 : i64, tpu.core_type = #tpu.core_type<tc>, window_params = [{transform_indices = @transform_0, window_bounds = array<i64: 8, 32>}, {transform_indices = @transform_1, window_bounds = array<i64: 128, 32>}, {transform_indices = @transform_2, window_bounds = array<i64: 1, 128>}, {transform_indices = @transform_3, window_bounds = array<i64: 8, 128>}]} {
    %c0 = arith.constant 0 : index
    %c0_0 = arith.constant 0 : index
    %0 = vector.load %arg2[%c0, %c0_0] : memref<8x32xf32, #tpu.memory_space<vmem>>, vector<8x32xf32>
    %c0_1 = arith.constant 0 : index
    %c0_2 = arith.constant 0 : index
    %1 = vector.load %arg3[%c0_1, %c0_2] : memref<128x32xf32, #tpu.memory_space<vmem>>, vector<128x32xf32>
    %cst = arith.constant dense<0.000000e+00> : vector<8x128xf32>
    %2 = tpu.matmul %0, %1, %cst {dimension_numbers = #tpu.dot_dimension_numbers<[1], [1], [0], [0], [0, 0, 1, 0], [], []>} : vector<8x32xf32>, vector<128x32xf32>, vector<8x128xf32> -> vector<8x128xf32>
    %c0_3 = arith.constant 0 : index
    %c0_4 = arith.constant 0 : index
    %3 = vector.load %arg4[%c0_3, %c0_4] : memref<1x128xf32, #tpu.memory_space<vmem>>, vector<1x128xf32>
    %4 = vector.broadcast %3 : vector<1x128xf32> to vector<8x128xf32>
    %5 = arith.addf %2, %4 : vector<8x128xf32>
    %cst_5 = arith.constant 0.000000e+00 : f32
    %6 = vector.broadcast %cst_5 : f32 to vector<8x128xf32>
    %7 = arith.maximumf %5, %6 : vector<8x128xf32>
    %c0_6 = arith.constant 0 : index
    %c0_7 = arith.constant 0 : index
    %8 = vector.load %arg5[%c0_6, %c0_7] : memref<8x128xf32, #tpu.memory_space<vmem>>, vector<8x128xf32>
    tpu.vector_store %arg5[%c0_6, %c0_7], %7 {strides = array<i32>} : memref<8x128xf32, #tpu.memory_space<vmem>>, vector<8x128xf32>,
    return
  }
  func.func @transform_0(%arg0: i32, %arg1: i32) -> (i32, i32) {
    %c0_i32 = arith.constant 0 : i32
    %c0_i32_0 = arith.constant 0 : i32
    return %arg0, %c0_i32 : i32, i32
  }
  func.func @transform_1(%arg0: i32, %arg1: i32) -> (i32, i32) {
    %c0_i32 = arith.constant 0 : i32
    %c0_i32_0 = arith.constant 0 : i32
    return %arg1, %c0_i32 : i32, i32
  }
  func.func @transform_2(%arg0: i32, %arg1: i32) -> (i32, i32) {
    %c0_i32 = arith.constant 0 : i32
    %c0_i32_0 = arith.constant 0 : i32
    return %c0_i32, %arg1 : i32, i32
  }
  func.func @transform_3(%arg0: i32, %arg1: i32) -> (i32, i32) {
    %c0_i32 = arith.constant 0 : i32
    return %arg0, %arg1 : i32, i32
  }
}

</mosaic_0001>

<bundles_post_ra>
// kernel: tpu_custom_call.1
= control target key start
LH: loop header
LB: loop body
LE: loop exit
PB: predicated region body
PF: predicated region fallthrough
CT: control target
= control target key end

     0   :  { %vm39_vm0 = vcmask 261120   ;;  %v307_v2 = vmov 0.0|0.0   ;;  %vm308_vm2 = vmmov 0   ;;  %v309_v5 = vmov 0.0   ;;  %s420_s0 = inlined_call_operand.vmem [shape: f32[8,32], index: 0, kind: input, shape index: {}]   ;;  %s421_s1 = inlined_call_operand.vmem [shape: f32[128,32], index: 1, kind: input, shape index: {}]   ;;  %s422_s2 = inlined_call_operand.vmem [shape: f32[1,128], index: 2, kind: input, shape index: {}]   ;;  %s423_s3 = inlined_call_operand.hbm [shape: f32[8,128], index: 3, kind: output, shape index: {}]  }
   0x1   :  { %v16_v0 = vld [vmem:[%s421_s1] sm:$0xff]  ;;  %v17_v1 = vld [vmem:[%s421_s1 + $0x8] sm:$0xff]  ;;  %247 = vmatprep.subr.bf16.mxu0 %v307_v2  ;;  %vm339_vm1 = vmpackc.low %vm39_vm0, %vm39_vm0  ;;  %244 = vmatprep.mubr.msk.f32.mxu0 %vm308_vm2, %v309_v5 }
   0x2   :  { %v248_v3 = vpack.c.bf16 %v17_v1, %v16_v0  ;;  %v18_v6 = vld [vmem:[%s421_s1 + $0x10] sm:$0xff]  ;;  %v19_v7 = vld [vmem:[%s421_s1 + $0x18] sm:$0xff] }
   0x4   :  { %250 = vmatpush3.bf16.xpose.msk.msra.mxu0 %vm339_vm1, %v248_v3 }
   0x5   :  { %251 = vmatprep.subr.bf16.mxu0 %v307_v2 }
   0x6   :  { %8 = vsyncpa [#allocation3], 0  ;;  %v252_v8 = vpack.c.bf16 %v19_v7, %v18_v6  ;;  %v20_v9 = vld [vmem:[%s421_s1 + $0x20] sm:$0xff]  ;;  %v21_v10 = vld [vmem:[%s421_s1 + $0x28] sm:$0xff]  ;;  %s310_s21 = smov [#allocation2]  }
   0x7   :  { %v256_v11 = vpack.c.bf16 %v21_v10, %v20_v9  ;;  %v22_v12 = vld [vmem:[%s421_s1 + $0x30] sm:$0xff]  ;;  %v23_v13 = vld [vmem:[%s421_s1 + $0x38] sm:$0xff]  ;;  %v24_v15 = vld [vmem:[%s421_s1 + $0x40] sm:$0xff]  ;;  %s169_s22 = sshll.u32 %s310_s21, 4  ;;  %s170_s22 = int_to_ptr.vmem [resolvable:$true] %s169_s22 }
   0x8   :  { %v260_v14 = vpack.c.bf16 %v23_v13, %v22_v12  ;;  %v25_v16 = vld [vmem:[%s421_s1 + $0x48] sm:$0xff]  ;;  %v26_v18 = vld [vmem:[%s421_s1 + $0x50] sm:$0xff]  ;;  %v27_v19 = vld [vmem:[%s421_s1 + $0x58] sm:$0xff]  ;;  %p288_p1 = scmp.lt.s32.totalorder %s170_s22, %s170_s22 }
   0x9   :  { %v264_v17 = vpack.c.bf16 %v25_v16, %v24_v15  ;;  %v268_v20 = vpack.c.bf16 %v27_v19, %v26_v18  ;;  %v28_v21 = vld [vmem:[%s421_s1 + $0x60] sm:$0xff]  ;;  %v29_v22 = vld [vmem:[%s421_s1 + $0x68] sm:$0xff]  ;;  %v30_v24 = vld [vmem:[%s421_s1 + $0x70] sm:$0xff] }
   0xa   :  { %v272_v23 = vpack.c.bf16 %v29_v22, %v28_v21  ;;  %v31_v25 = vld [vmem:[%s421_s1 + $0x78] sm:$0xff]  ;;  %v15_v27 = vld [vmem:[%s420_s0] sm:$0xff]  ;;  %s283_s1 = scalar_lea.vmem %s170_s22, 128 }
   0xb   :  { %v276_v26 = vpack.c.bf16 %v31_v25, %v30_v24  ;;  %v177_v28 = vld [vmem:[%s422_s2] ss:$0 sm:$0xff]  ;;  %p284_p0 = scmp.ne.s32.totalorder %s170_s22, %s283_s1  ;;  %p289_p2 = scmp.lt.s32.totalorder %s283_s1, %s283_s1 }
   0xc   :  { %254 = vmatpush3.bf16.xpose.msk.msra.mxu0 %vm339_vm1, %v252_v8 }
   0xd   :  { %255 = vmatprep.subr.bf16.mxu0 %v307_v2  ;;  %p290_p3 = por %p289_p2, %p288_p1 }
   0xf   :  { %p291_p4 = pnand %p290_p3, %p284_p0 }
  0x14   :  { %258 = vmatpush3.bf16.xpose.msk.msra.mxu0 %vm339_vm1, %v256_v11 }
  0x15   :  { %259 = vmatprep.subr.bf16.mxu0 %v307_v2 }
  0x1c   :  { %262 = vmatpush3.bf16.xpose.msk.msra.mxu0 %vm339_vm1, %v260_v14 }
  0x1d   :  { %263 = vmatprep.subr.bf16.mxu0 %v307_v2 }
  0x24   :  { %266 = vmatpush3.bf16.xpose.msk.msra.mxu0 %vm339_vm1, %v264_v17 }
  0x25   :  { %267 = vmatprep.subr.bf16.mxu0 %v307_v2 }
  0x2c   :  { %270 = vmatpush3.bf16.xpose.msk.msra.mxu0 %vm339_vm1, %v268_v20 }
  0x2d   :  { %271 = vmatprep.subr.bf16.mxu0 %v307_v2 }
  0x34   :  { %274 = vmatpush3.bf16.xpose.msk.msra.mxu0 %vm339_vm1, %v272_v23 }
  0x35   :  { %275 = vmatprep.subr.bf16.mxu0 %v307_v2 }
  0x3c   :  { %278 = vmatpush3.bf16.xpose.msk.msra.mxu0 %vm339_vm1, %v276_v26 }
  0x43   :  { %245 = vmatmul.mubr.msk.f32.vlgmr.msra.gmra.mrb[0].mxu0 %vm39_vm0, %v15_v27 }
 0x116   :  { %v157_v29 = vpop.f32.mrb[0].mxu0 }
 0x117   :  { %v158_v30 = vadd.f32 %v177_v28, %v157_v29  ;;  %v246_v31 = vpop.f32.mrb[1].mxu0 }
 0x119   :  { %v161_v32 = vmax.f32 %v158_v30, 0.0 }
 0x11b   :  { %162 = vst [vmem:[#allocation2] sm:$0xff] %v161_v32 }
 0x11c   :  { %294 = shalt.err (!%p291_p4)
}
 0x11d   :  { %s295_s24 = scalar_lea.hbm %s423_s3, 128 }
 0x11e   :  { %p296_p5 = scmp.ne.s32.totalorder %s423_s3, %s295_s24  ;;  %p299_p6 = scmp.lt.u32.totalorder %s295_s24, %s423_s3 }
 0x120   :  { %p301_p7 = pnand %p299_p6, %p296_p5 }
 0x122   :  { %304 = shalt.err (!%p301_p7)
}
 0x123   :  { %172 = dma.vmem_to_hbm [thread:$0]  %s170_s22, 128, %s423_s3, [#allocation3]  }
 0x124   :  { %305 = dma.done.wait [#allocation3], 128  }
 0x125   :  { %306 = vsyncadd [#allocation3], 4294967168 }
 0x126   :  { %176 = vsyncpa [#allocation3], 1 }

</bundles_post_ra>
